<compile_context>
chip_gen: v7x
topology: tpu7x:2x2x1
jax: 0.10.0
libtpu: 0.0.40
codegen_flags: <defaults>
</compile_context>

<pallas_src>
import math
from functools import partial
from types import SimpleNamespace

import jax
import jax.numpy as jnp
from jax.experimental import pallas as pl
from jax.experimental.pallas import tpu as pltpu

# ---------------------------------------------------------------------------
# Module constants (surrogate model dimensions)
# ---------------------------------------------------------------------------
_LAT_C = 16       # Wan VAE latent channels
_PATCH = 8        # spatial compression factor of the surrogate VAE
_HID = 64         # surrogate DiT hidden width
_AUD_DIM = 32     # surrogate audio-embedding width
_TXT_DIM = 32     # surrogate text-byte embedding width
_PACK = 8         # tokens packed per lane-dense row (8 * _LAT_C = 128 lanes)

_TPU_KIND = None


def _tpu_kind():
    global _TPU_KIND
    if _TPU_KIND is None:
        try:
            _TPU_KIND = jax.devices()[0].device_kind.lower()
        except Exception:
            _TPU_KIND = ''
    return _TPU_KIND


def _vmem_limit_bytes():
    # v7x has 64 MiB VMEM per TC; v5e/v6e have 128 MiB.
    return 48 * 1024 * 1024 if 'v7' in _tpu_kind() else 96 * 1024 * 1024


def _bf16_eup_ok():
    # bf16 VPU/EUP path exists on v6e/v7x; v5e (and older) stay f32.
    k = _tpu_kind()
    return ('v6' in k) or ('v7' in k)


def _round_up(x, m):
    return -(-x // m) * m


def _block_diag(w, reps):
    """(K, N) -> (reps*K, reps*N) block diagonal (8 packed tokens share one matmul)."""
    k, n = w.shape
    eye = jnp.eye(reps, dtype=w.dtype)
    return (eye[:, None, :, None] * w[None, :, None, :]).reshape(reps * k, reps * n)


def _compiler_params():
    return pltpu.CompilerParams(
        dimension_semantics=("parallel",),
        vmem_limit_bytes=_vmem_limit_bytes())


# ---------------------------------------------------------------------------
# Pallas kernels
# ---------------------------------------------------------------------------

def _linear_kernel(x_ref, w_ref, b_ref, o_ref, *, act):
    # bf16 operands into the MXU (native on v5e/v6e/v7x), f32 accumulate,
    # f32 element-wise epilogue (v5e VPU/EUP have no bf16 path).
    x = x_ref[...].astype(jnp.bfloat16)
    y = jnp.dot(x, w_ref[...], preferred_element_type=jnp.float32)
    y = y + b_ref[...].astype(jnp.float32)
    if act == "gelu":
        y = jax.nn.gelu(y, approximate=True)
    elif act == "sigmoid":
        y = jax.nn.sigmoid(y)
    o_ref[...] = y.astype(o_ref.dtype)


def linear_pallas(x, w, b, act=None, tm=512, out_dtype=None):
    """y = act(x @ w + b).  x:(M,K)  w:(K,N)  b:(1,N).  Tiled over M (no pad copy)."""
    M, K = x.shape
    K2, N = w.shape
    assert K == K2 and b.shape == (1, N)
    out_dtype = x.dtype if out_dtype is None else out_dtype
    w = w.astype(jnp.bfloat16)            # MXU-native operand, half the weight DMA bytes
    b = b.astype(jnp.float32)
    TM = M if M <= tm else tm             # full-extent block for small M
    grid = pl.cdiv(M, TM)                 # tail block (if any) is masked by Pallas
    return pl.pallas_call(
        partial(_linear_kernel, act=act),
        out_shape=jax.ShapeDtypeStruct((M, N), out_dtype),
        grid=(grid,),
        in_specs=[
            pl.BlockSpec((TM, K), lambda i: (i, 0)),
            pl.BlockSpec((K, N), lambda i: (0, 0)),
            pl.BlockSpec((1, N), lambda i: (0, 0)),
        ],
        out_specs=pl.BlockSpec((TM, N), lambda i: (i, 0)),
        compiler_params=_compiler_params(),
    )(x, w, b)


def _affine_kernel(x_ref, o_ref, *, clip):
    x = x_ref[...].astype(jnp.float32)
    if clip:
        x = jnp.clip(x, 0.0, 1.0)
    o_ref[...] = (x * 2.0 - 1.0).astype(o_ref.dtype)


def scale_to_pm1(x, clip=False, cols=512, row_tile=1024):
    """Elementwise (optional clip(0,1)) * 2 - 1 on a lane-dense 2-D view."""
    orig_shape, dtype = x.shape, x.dtype
    flat = x.reshape(-1)
    n = flat.shape[0]
    if n % cols:
        # ragged tail only (not hit in this script) -> minimal pad
        flat = jnp.pad(flat, (0, cols - n % cols))
    rows = flat.shape[0] // cols
    x2 = flat.reshape(rows, cols)
    tr = rows if rows <= row_tile else row_tile
    grid = pl.cdiv(rows, tr)
    out = pl.pallas_call(
        partial(_affine_kernel, clip=clip),
        out_shape=jax.ShapeDtypeStruct((rows, cols), dtype),
        grid=(grid,),
        in_specs=[pl.BlockSpec((tr, cols), lambda i: (i, 0))],
        out_specs=pl.BlockSpec((tr, cols), lambda i: (i, 0)),
        compiler_params=_compiler_params(),
    )(x2)
    return out.reshape(-1)[:n].reshape(orig_shape)


def _denoise_fused_kernel(z_ref, y1_ref, wz_ref, w2_ref, bp_ref, bn_ref, b2_ref,
                          o_ref, *, scale, dt, num_steps, bf16_eup):
    """ALL denoise steps for one packed (8-tokens-per-row) latent tile, in VMEM.

    z_ref  : (TR, 128)  = 8 tokens x 16 latent channels, lane-dense, f32
    y1_ref : (TR, 512)  = hoisted y_tok @ W1_y contribution (constant over steps), bf16
    wz_ref : (128, 512) = block-diag(W1_z, 8), bf16
    w2_ref : (512, 128) = block-diag(W2, 8),  bf16
    """
    z = z_ref[...].astype(jnp.float32)
    y1 = y1_ref[...].astype(jnp.float32)
    wz = wz_ref[...]
    w2 = w2_ref[...]
    bp = bp_ref[...].astype(jnp.float32)
    bn = bn_ref[...].astype(jnp.float32)
    b2 = b2_ref[...].astype(jnp.float32)

    def one_step(zc):
        # Shared layer-1 matmul (pos/neg CFG branches only differ by bias).
        h = jnp.dot(zc.astype(jnp.bfloat16), wz,
                    preferred_element_type=jnp.float32) + y1
        hp = h + bp
        hn = h + bn
        if bf16_eup:
            gp = jax.nn.gelu(hp.astype(jnp.bfloat16), approximate=True).astype(jnp.float32)
            gn = jax.nn.gelu(hn.astype(jnp.bfloat16), approximate=True).astype(jnp.float32)
        else:
            gp = jax.nn.gelu(hp, approximate=True)
            gn = jax.nn.gelu(hn, approximate=True)
        # CFG combine folded into the layer-2 input.
        g = gn + scale * (gp - gn)
        pred = jnp.dot(g.astype(jnp.bfloat16), w2,
                       preferred_element_type=jnp.float32) + b2
        return zc - dt * pred

    if num_steps <= 8:
        for _ in range(num_steps):        # unrolled: static short trip count
            z = one_step(z)
    else:
        z = jax.lax.fori_loop(0, num_steps, lambda i, zc: one_step(zc), z)
    o_ref[...] = z.astype(o_ref.dtype)


def denoise_pallas(zp, y1p, wz_bd, w2_bd, b_pos, b_neg, b2, scale, dt,
                   num_steps, tr, bf16_eup):
    rows, zc = zp.shape
    return pl.pallas_call(
        partial(_denoise_fused_kernel, scale=float(scale), dt=float(dt),
                num_steps=int(num_steps), bf16_eup=bool(bf16_eup)),
        out_shape=jax.ShapeDtypeStruct(zp.shape, zp.dtype),
        grid=(rows // tr,),
        in_specs=[
            pl.BlockSpec((tr, zc), lambda i: (i, 0)),
            pl.BlockSpec((tr, y1p.shape[1]), lambda i: (i, 0)),
            pl.BlockSpec(wz_bd.shape, lambda i: (0, 0)),
            pl.BlockSpec(w2_bd.shape, lambda i: (0, 0)),
            pl.BlockSpec(b_pos.shape, lambda i: (0, 0)),
            pl.BlockSpec(b_neg.shape, lambda i: (0, 0)),
            pl.BlockSpec(b2.shape, lambda i: (0, 0)),
        ],
        out_specs=pl.BlockSpec((tr, zc), lambda i: (i, 0)),
        compiler_params=_compiler_params(),
    )(zp, y1p, wz_bd, w2_bd, b_pos, b_neg, b2)


# ---------------------------------------------------------------------------
# Surrogate sub-models (module-level so they can live inside jit)
# ---------------------------------------------------------------------------

def _encode_video(params, video):
    # Surrogate Wan VAE encoder: (1,3,F,H,W) -> (1,16,F,H/8,W/8); lane-dense
    # packed (8 patch tokens / row, block-diag weight -> 128-lane output).
    _, c, f, hh, ww = video.shape
    gh, gw = hh // _PATCH, ww // _PATCH
    x = jnp.transpose(video[0], (1, 2, 3, 0))                    # (F,H,W,3)
    x = x.reshape(f, gh, _PATCH, gw, _PATCH, c)
    x = jnp.transpose(x, (0, 1, 3, 2, 4, 5)).reshape(f * gh * gw, _PATCH * _PATCH * c)
    ntok = f * gh * gw
    rows = -(-ntok // _PACK)
    pad = rows * _PACK - ntok
    xf = x.astype(jnp.float32)
    if pad:
        xf = jnp.pad(xf, ((0, pad), (0, 0)))
    xp = xf.reshape(rows, _PACK * _PATCH * _PATCH * c)            # (rows, 1536)
    latp = linear_pallas(xp, params['vae_enc_w_bd'], params['vae_enc_b_bd'])  # (rows, 128)
    lat = latp.reshape(rows * _PACK, _LAT_C)[:ntok]
    lat = lat.reshape(f, gh, gw, _LAT_C)
    return jnp.transpose(lat, (3, 0, 1, 2))[None]                 # (1,16,F,gh,gw)


def _decode_latents_packed(params, zp, ntok, t, gh, gw):
    # Surrogate Wan VAE decoder, consuming the already-packed (rows,128) latents
    # with a block-diag (128, 6144) weight (K=128 on the MXU, lane-dense output).
    rows = zp.shape[0]
    n_out = 4 * 3 * _PATCH * _PATCH                               # 768 per token
    pixp = linear_pallas(zp, params['vae_dec_w_bd'], params['vae_dec_b_bd'],
                         act="sigmoid", tm=128)                   # (rows, 6144)
    pix = pixp.reshape(rows * _PACK, n_out)[:ntok]
    pix = pix.reshape(t, gh, gw, 4, _PATCH, _PATCH, 3)
    pix = jnp.transpose(pix, (0, 3, 6, 1, 4, 2, 5))               # (T,4,3,gh,P,gw,P)
    pix = pix.reshape(t * 4, 3, gh * _PATCH, gw * _PATCH)
    return pix[3:][None]                                          # first latent frame -> 1 video frame


def _segment_core(params, img_lat, y, audio, txt_pos, txt_neg, noise,
                  *, num_steps, cfg_scale, bf16_eup):
    """One segment: pack -> hoisted y1 -> fused multi-step CFG+Euler denoise -> decode."""
    c = _LAT_C
    _, _, t_lat, gh, gw = img_lat.shape
    ntok = t_lat * gh * gw
    yc = y.shape[1]

    z = img_lat.astype(jnp.float32) + 0.1 * noise
    z_tok = jnp.transpose(z[0], (1, 2, 3, 0)).reshape(ntok, c)
    y_tok = jnp.transpose(y[0].astype(jnp.float32), (1, 2, 3, 0)).reshape(ntok, yc)

    audio_pool = jnp.mean(audio[0].astype(jnp.float32), axis=0, keepdims=True)
    aud_h = linear_pallas(audio_pool, params['aud_proj_w'], params['aud_proj_b'])
    b_pos = params['dit_b1'] + aud_h + txt_pos        # conditioning folded into bias
    b_neg = params['dit_b1'] + aud_h + txt_neg

    # Pack 8 tokens per row -> lane-dense (rows,128)/(rows,512) layout; pick a
    # row tile that keeps >=2 grid iterations (v7x has 2 TensorCores).
    rows_needed = -(-ntok // _PACK)
    rows = _round_up(rows_needed, 8)
    if rows >= 1024:
        tr = 512
    elif rows >= 16:
        tr = max(8, _round_up(rows // 2, 8))
    else:
        tr = rows
    rows = _round_up(rows, tr)
    pad_tok = rows * _PACK - ntok
    if pad_tok:
        z_tok = jnp.pad(z_tok, ((0, pad_tok), (0, 0)))
        y_tok = jnp.pad(y_tok, ((0, pad_tok), (0, 0)))
    zp = z_tok.reshape(rows, _PACK * c)                           # (rows, 128)
    yp_in = y_tok.reshape(rows, _PACK * yc)                       # (rows, 136)

    # Hoisted: the y contribution to layer-1 is constant across denoise steps.
    # Computed directly in packed layout (512-lane output), stored bf16.
    y1p = linear_pallas(yp_in, params['dit_w1y_bd'], params['dit_w1y_b_bd'],
                        out_dtype=jnp.bfloat16)                   # (rows, 512) bf16

    bpos_p = jnp.tile(b_pos, (1, _PACK))                          # (1, 512)
    bneg_p = jnp.tile(b_neg, (1, _PACK))
    b2_p = jnp.tile(params['dit_b2'], (1, _PACK))                 # (1, 128)

    dt = 1.0 / num_steps
    zp = denoise_pallas(zp, y1p, params['dit_w1z_bd'], params['dit_w2_bd'],
                        bpos_p, bneg_p, b2_p, cfg_scale, dt, num_steps, tr, bf16_eup)

    z_out = zp.reshape(rows * _PACK, c)[:ntok]
    latents = jnp.transpose(z_out.reshape(t_lat, gh, gw, c), (3, 0, 1, 2))[None]
    frames = _decode_latents_packed(params, zp, ntok, t_lat, gh, gw)
    return frames, latents


# ---------------------------------------------------------------------------
# Dependent helper functions (exact ports; glue, not the hot path)
# ---------------------------------------------------------------------------

def match_size(image_size, h, w):
    ratio_ = 9999
    size_ = 9999
    select_size = None
    for image_s in image_size:
        ratio_tmp = abs(image_s[0] / image_s[1] - h / w)
        size_tmp = abs(max(image_s) - max(w, h))
        if ratio_tmp < ratio_:
            ratio_ = ratio_tmp
            size_ = size_tmp
            select_size = image_s
        if ratio_ == ratio_tmp:
            if size_ == size_tmp:
                select_size = image_s
    return select_size


def resize_pad(image, ori_size, tgt_size):
    # image: (B, C, H, W).  torchvision bilinear Resize approximated by
    # jax.image.resize; F.pad with negative values crops (mirrored here).
    h, w = ori_size
    scale_ratio = max(tgt_size[0] / h, tgt_size[1] / w)
    scale_h = int(h * scale_ratio)
    scale_w = int(w * scale_ratio)
    b, c = image.shape[:2]
    image = jax.image.resize(image, (b, c, scale_h, scale_w), method="bilinear")
    padding_h = tgt_size[0] - scale_h
    padding_w = tgt_size[1] - scale_w
    pad_top = padding_h // 2
    pad_bottom = padding_h - pad_top
    pad_left = padding_w // 2
    pad_right = padding_w - pad_left

    def _pad_or_crop(x, lo, hi, axis):
        if lo < 0:
            x = jax.lax.slice_in_dim(x, -lo, x.shape[axis], axis=axis)
            lo = 0
        if hi < 0:
            x = jax.lax.slice_in_dim(x, 0, x.shape[axis] + hi, axis=axis)
            hi = 0
        pads = [(0, 0)] * x.ndim
        pads[axis] = (lo, hi)
        return jnp.pad(x, pads)

    image = _pad_or_crop(image, pad_top, pad_bottom, axis=2)
    image = _pad_or_crop(image, pad_left, pad_right, axis=3)
    return image


# ---------------------------------------------------------------------------
# Pipeline
# ---------------------------------------------------------------------------

class WanInferencePipeline:
    LAT_C = _LAT_C
    PATCH = _PATCH
    HID = _HID
    AUD_DIM = _AUD_DIM
    TXT_DIM = _TXT_DIM
    PACK_TOK = _PACK

    def __init__(self, args):
        self.args = args
        if args.dtype == 'bf16':
            self.dtype = jnp.bfloat16
        elif args.dtype == 'fp16':
            self.dtype = jnp.float16
        else:
            self.dtype = jnp.float32
        self.params = self._init_params(jax.random.PRNGKey(0))
        self._txt_cache = {}
        self._bf16_eup = _bf16_eup_ok()
        # Per-segment denoise+decode fused under jit (static step count / scale).
        self._segment_fn = jax.jit(
            _segment_core, static_argnames=('num_steps', 'cfg_scale', 'bf16_eup'))
        # TODO(synk): ModelManager / WanVideoPipeline checkpoint loading, LoRA
        # injection, torch.distributed + xfuser init, FSDP sharding and VRAM
        # management have no Pallas equivalent; deterministic surrogate
        # weights are used instead.

    def _init_params(self, key):
        def w(k, shape):
            return jax.random.normal(k, shape, jnp.float32) / math.sqrt(shape[0])
        ks = jax.random.split(key, 8)
        spf = self.args.sample_rate // self.args.fps
        patch_in = 3 * _PATCH * _PATCH
        dit_w1 = w(ks[4], (2 * _LAT_C + 1, _HID))
        dit_w2 = w(ks[5], (_HID, _LAT_C))
        vae_enc_w = w(ks[1], (patch_in, _LAT_C))
        vae_dec_w = w(ks[6], (_LAT_C, 4 * patch_in))
        return {
            'aud_enc_w': w(ks[0], (spf, _AUD_DIM)),
            'aud_enc_b': jnp.zeros((1, _AUD_DIM), jnp.float32),
            'txt_w': w(ks[2], (_TXT_DIM, _HID)),
            'txt_b': jnp.zeros((1, _HID), jnp.float32),
            'aud_proj_w': w(ks[3], (_AUD_DIM, _HID)),
            'aud_proj_b': jnp.zeros((1, _HID), jnp.float32),
            'dit_w1': dit_w1,
            'dit_b1': jnp.zeros((1, _HID), jnp.float32),
            'dit_w2': dit_w2,
            'dit_b2': jnp.zeros((1, _LAT_C), jnp.float32),
            # Pre-packed block-diagonal weights for lane-dense 8-token-packed
            # kernels (bf16 MXU operands, half the DMA bytes).
            'vae_enc_w_bd': _block_diag(vae_enc_w, _PACK).astype(jnp.bfloat16),
            'vae_enc_b_bd': jnp.zeros((1, _PACK * _LAT_C), jnp.float32),
            'vae_dec_w_bd': _block_diag(vae_dec_w, _PACK).astype(jnp.bfloat16),
            'vae_dec_b_bd': jnp.zeros((1, _PACK * 4 * patch_in), jnp.float32),
            'dit_w1z_bd': _block_diag(dit_w1[:_LAT_C], _PACK).astype(jnp.bfloat16),
            'dit_w1y_bd': _block_diag(dit_w1[_LAT_C:], _PACK).astype(jnp.bfloat16),
            'dit_w1y_b_bd': jnp.zeros((1, _PACK * _HID), jnp.float32),
            'dit_w2_bd': _block_diag(dit_w2, _PACK).astype(jnp.bfloat16),
        }

    # ------------------------- surrogate sub-models -------------------------

    def _embed_text(self, prompt):
        # Surrogate T5: byte codes -> Pallas linear (cached per prompt string).
        if prompt in self._txt_cache:
            return self._txt_cache[prompt]
        codes = [ord(ch) % 256 for ch in prompt][:_TXT_DIM]
        codes = codes + [0] * (_TXT_DIM - len(codes))
        vec = jnp.asarray(codes, jnp.float32).reshape(1, _TXT_DIM) / 255.0
        emb = linear_pallas(vec, self.params['txt_w'], self.params['txt_b'])
        self._txt_cache[prompt] = emb
        return emb

    def encode_video(self, video):
        return _encode_video(self.params, video)

    def log_video(self, img_lat, prompt, prefix_overlap, image_emb, audio_emb,
                  negative_prompt, num_inference_steps, cfg_scale, audio_cfg_scale,
                  return_latent=True, seed=0):
        # Surrogate DiT denoising: ALL CFG+Euler steps fused into one Pallas call.
        # TODO(synk): tea-cache, USP sequence parallelism and the separate
        # audio-CFG branch of the real Wan pipeline are not replicated.
        noise = jax.random.normal(jax.random.PRNGKey(seed), img_lat.shape, jnp.float32)
        txt_pos = self._embed_text(prompt)
        txt_neg = self._embed_text(negative_prompt)
        if 'audio_emb' in audio_emb:
            audio = audio_emb['audio_emb']
        else:
            audio = jnp.zeros((1, 1, _AUD_DIM), jnp.float32)
        frames, latents = self._segment_fn(
            self.params, img_lat, image_emb['y'], audio, txt_pos, txt_neg, noise,
            num_steps=int(num_inference_steps), cfg_scale=float(cfg_scale),
            bf16_eup=self._bf16_eup)
        return frames, None, latents

    # ------------------------------ forward ------------------------------

    def forward(self, prompt, image=None, audio_samples=None, seq_len=101,
                height=720, width=720, overlap_frame=None, num_steps=None,
                negative_prompt=None, guidance_scale=None, audio_scale=None):
        args = self.args
        overlap_frame = overlap_frame if overlap_frame is not None else args.overlap_frame
        num_steps = num_steps if num_steps is not None else args.num_steps
        negative_prompt = negative_prompt if negative_prompt is not None else args.negative_prompt
        guidance_scale = guidance_scale if guidance_scale is not None else args.guidance_scale
        audio_scale = audio_scale if audio_scale is not None else args.audio_scale

        if image is not None:
            # TODO(synk): PIL Image.open + ToTensor replaced by an in-memory [0,1] array.
            _, _, h, w = image.shape
            select_size = match_size(getattr(args, f'image_sizes_{args.max_hw}'), h, w)
            image = resize_pad(image, (h, w), select_size)
            image = scale_to_pm1(image)                 # image * 2.0 - 1.0   (Pallas elementwise)
            image = image[:, :, None]                   # (1, 3, 1, H, W)
        else:
            select_size = [height, width]

        L = int(args.max_tokens * 16 * 16 * 4 / select_size[0] / select_size[1])
        L = L // 4 * 4 + 1 if L % 4 != 0 else L - 3
        T = (L + 3) // 4

        if args.i2v:
            if args.random_prefix_frames:
                fixed_frame = overlap_frame
                assert fixed_frame % 4 == 1
            else:
                fixed_frame = 1
            prefix_lat_frame = (3 + fixed_frame) // 4
            first_fixed_frame = 1
        else:
            fixed_frame = 0
            prefix_lat_frame = 0
            first_fixed_frame = 0

        if audio_samples is not None and args.use_audio:
            # TODO(synk): librosa load + Wav2Vec2FeatureExtractor + wav2vec
            # hidden-state concatenation replaced by a deterministic Pallas
            # per-frame linear audio encoder over the raw waveform.
            input_values = audio_samples.astype(jnp.float32)
            ori_audio_len = audio_len = math.ceil(
                input_values.shape[0] / args.sample_rate * args.fps)
            input_values = input_values[None]
            if audio_len < L - first_fixed_frame:
                audio_len = audio_len + (L - first_fixed_frame - audio_len % (L - first_fixed_frame))
            elif (audio_len - (L - first_fixed_frame)) % (L - fixed_frame) != 0:
                audio_len = audio_len + (L - fixed_frame -
                                         (audio_len - (L - first_fixed_frame)) % (L - fixed_frame))
            spf = int(args.sample_rate / args.fps)
            input_values = jnp.pad(
                input_values, ((0, 0), (0, audio_len * spf - input_values.shape[1])))
            audio_frames = input_values.reshape(audio_len, spf)
            audio_embeddings = linear_pallas(
                audio_frames, self.params['aud_enc_w'], self.params['aud_enc_b'])
            seq_len = audio_len
            audio_prefix = jnp.zeros_like(audio_embeddings[:first_fixed_frame])
        else:
            audio_embeddings = None
            ori_audio_len = seq_len - 1

        times = (seq_len - L + first_fixed_frame) // (L - fixed_frame) + 1
        if times * (L - fixed_frame) + fixed_frame < seq_len:
            times += 1

        video = []
        image_emb = {}
        img_lat = None
        if args.i2v:
            img_lat = self.encode_video(image.astype(self.dtype)).astype(jnp.float32)
            image_cat = jnp.tile(img_lat, (1, 1, T, 1, 1))
            msk = jnp.zeros_like(image_cat[:, :1])
            msk = msk.at[:, :, 1:].set(1.0)
            image_emb['y'] = jnp.concatenate([image_cat, msk], axis=1)   # (1, 17, T, gh, gw)

        for t in range(times):
            audio_emb = {}
            if t == 0:
                overlap = first_fixed_frame
            else:
                overlap = fixed_frame
                image_emb['y'] = image_emb['y'].at[:, -1:, :prefix_lat_frame].set(0.0)
            prefix_overlap = (3 + overlap) // 4
            if audio_embeddings is not None:
                if t == 0:
                    audio_tensor = audio_embeddings[: min(L - overlap, audio_embeddings.shape[0])]
                else:
                    audio_start = L - first_fixed_frame + (t - 1) * (L - overlap)
                    audio_tensor = audio_embeddings[
                        audio_start: min(audio_start + L - overlap, audio_embeddings.shape[0])]
                audio_tensor = jnp.concatenate([audio_prefix, audio_tensor], axis=0)
                audio_prefix = audio_tensor[-fixed_frame:]
                audio_emb['audio_emb'] = audio_tensor[None].astype(self.dtype)
            else:
                audio_prefix = None
            if image is not None and img_lat is None:
                img_lat = self.encode_video(image.astype(self.dtype)).astype(jnp.float32)
                assert img_lat.shape[2] == prefix_overlap
            img_lat = jnp.concatenate(
                [img_lat,
                 jnp.zeros_like(jnp.tile(img_lat[:, :, :1], (1, 1, T - prefix_overlap, 1, 1)))],
                axis=2)
            frames, _, latents = self.log_video(
                img_lat, prompt, prefix_overlap, image_emb, audio_emb, negative_prompt,
                num_inference_steps=num_steps, cfg_scale=guidance_scale,
                audio_cfg_scale=audio_scale if audio_scale is not None else guidance_scale,
                return_latent=True, seed=t)
            img_lat = None
            # (frames[:, -fixed_frame:].clip(0,1)*2-1).permute(0,2,1,3,4)
            # TODO(synk): could be fused into the decoder epilogue (sigmoid output
            # is already in [0,1]); kept as a tiny separate Pallas elementwise pass.
            image = jnp.transpose(
                scale_to_pm1(frames[:, -fixed_frame:], clip=True), (0, 2, 1, 3, 4))
            if t == 0:
                video.append(frames)
            else:
                video.append(frames[:, overlap:])
        video = jnp.concatenate(video, axis=1)
        video = video[:, : ori_audio_len + 1]
        return video


# ---------------------------------------------------------------------------

if __name__ == "__main__":
    args = SimpleNamespace(
        dtype='fp32', i2v=True, use_audio=True, random_prefix_frames=True,
        overlap_frame=1, num_steps=4, negative_prompt='', guidance_scale=4.5,
        audio_scale=None, max_tokens=32, sample_rate=16000, fps=16,
        max_hw='720', image_sizes_720=[[64, 64]], rank=0, tea_cache_l1_thresh=None,
    )
    pipe = WanInferencePipeline(args)

    key = jax.random.PRNGKey(0)
    k_img, k_aud = jax.random.split(key)
    # Synthetic "PIL image" in [0,1], NCHW, 48x48 -> matched/resized to 64x64.
    image = jax.random.uniform(k_img, (1, 3, 48, 48), jnp.float32)
    # Synthetic waveform: 9000 samples @16kHz, 16 fps -> 9 original frames.
    audio = jax.random.normal(k_aud, (9000,), jnp.float32) * 0.1

    video = pipe.forward('a person talking', image=image, audio_samples=audio)
    video = jax.block_until_ready(video)
    assert video.shape == (1, 10, 3, 64, 64), video.shape
    assert bool(jnp.all(jnp.isfinite(video)))
    print("KERNEL_OK")
</pallas_src>

<mosaic_0001>
module attributes {stable_mosaic.version = 11 : i64} {
  func.func @_affine_kernel(%arg0: i32, %arg1: memref<24x512xf32, #tpu.memory_space<vmem>>, %arg2: memref<24x512xf32, #tpu.memory_space<vmem>>) attributes {dimension_semantics = [#tpu.dimension_semantics<parallel>], iteration_bounds = array<i64: 1>, scalar_prefetch = 0 : i64, scratch_operands = 0 : i64, tpu.core_type = #tpu.core_type<tc>, window_params = [{transform_indices = @transform_0, window_bounds = array<i64: 24, 512>}, {transform_indices = @transform_1, window_bounds = array<i64: 24, 512>}]} {
    %c0 = arith.constant 0 : index
    %c0_0 = arith.constant 0 : index
    %0 = vector.load %arg1[%c0, %c0_0] : memref<24x512xf32, #tpu.memory_space<vmem>>, vector<24x512xf32>
    %cst = arith.constant 2.000000e+00 : f32
    %1 = vector.broadcast %cst : f32 to vector<24x512xf32>
    %2 = arith.mulf %0, %1 : vector<24x512xf32>
    %cst_1 = arith.constant 1.000000e+00 : f32
    %3 = vector.broadcast %cst_1 : f32 to vector<24x512xf32>
    %4 = arith.subf %2, %3 : vector<24x512xf32>
    %c0_2 = arith.constant 0 : index
    %c0_3 = arith.constant 0 : index
    %5 = vector.load %arg2[%c0_2, %c0_3] : memref<24x512xf32, #tpu.memory_space<vmem>>, vector<24x512xf32>
    tpu.vector_store %arg2[%c0_2, %c0_3], %4 {strides = array<i32>} : memref<24x512xf32, #tpu.memory_space<vmem>>, vector<24x512xf32>,
    return
  }
  func.func @transform_0(%arg0: i32) -> (i32, i32) {
    %c0_i32 = arith.constant 0 : i32
    %c0_i32_0 = arith.constant 0 : i32
    return %arg0, %c0_i32 : i32, i32
  }
  func.func @transform_1(%arg0: i32) -> (i32, i32) {
    %c0_i32 = arith.constant 0 : i32
    %c0_i32_0 = arith.constant 0 : i32
    return %arg0, %c0_i32 : i32, i32
  }
}

</mosaic_0001>

<bundles_post_ra>
// kernel: tpu_custom_call.1
= control target key start
LH: loop header
LB: loop body
LE: loop exit
PB: predicated region body
PF: predicated region fallthrough
CT: control target
= control target key end

     0   :  { %6 = vsyncpa [#allocation3], 0  ;;  %s196_s0 = inlined_call_operand.hbm [shape: f32[24,512], index: 0, kind: input, shape index: {}]   ;;  %s197_s1 = inlined_call_operand.hbm [shape: f32[24,512], index: 1, kind: output, shape index: {}]  }
   0x1   :  { %7 = vsyncpa [#allocation4], 0  ;;  %s152_s6 = smov [#allocation2]   ;;  %s104_s10 = scalar_lea.hbm %s196_s0, 1536 }
   0x2   :  { %s13_s7 = sshll.u32 %s152_s6, 4  ;;  %p105_p0 = scmp.ne.s32.totalorder %s196_s0, %s104_s10  ;;  %s14_s7 = int_to_ptr.vmem [resolvable:$true] %s13_s7 }
   0x3   :  { %p108_p1 = scmp.lt.u32.totalorder %s104_s10, %s196_s0 }
   0x5   :  { %p110_p2 = pnand %p108_p1, %p105_p0 }
   0x7   :  { %113 = shalt.err (!%p110_p2)
}
   0x8   :  { %s114_s15 = scalar_lea.vmem %s14_s7, 1536  ;;  %p119_p4 = scmp.lt.s32.totalorder %s14_s7, %s14_s7 }
   0x9   :  { %p115_p3 = scmp.ne.s32.totalorder %s14_s7, %s114_s15  ;;  %p120_p5 = scmp.lt.s32.totalorder %s114_s15, %s114_s15 }
   0xb   :  { %p121_p6 = por %p120_p5, %p119_p4 }
   0xd   :  { %p122_p7 = pnand %p121_p6, %p115_p3 }
   0xf   :  { %125 = shalt.err (!%p122_p7)
}
  0x10   :  { %s153_s16 = smov 512   ;;  %s154_s17 = smov 32  }
  0x11   :  { %19 = dma.hbm_to_vmem [thread:$0]  %s196_s0, 1536, %s14_s7, [#allocation3], %s153_s16, %s153_s16, %s154_s17  }
  0x12   :  { %148 = dma.done.wait [#allocation3], 1536  }
  0x13   :  { %149 = vsyncadd [#allocation3], 4294965760  ;;  %v23_v0 = vld [vmem:[#allocation2] sm:$0xff]  ;;  %v24_v1 = vld [vmem:[#allocation2 + $0x8] sm:$0xff]  ;;  %s155_s0 = smov [#allocation5]  }
  0x14   :  { %v25_v2 = vld [vmem:[#allocation2 + $0x10] sm:$0xff]  ;;  %v35_v3 = vmul.f32 2.0, %v23_v0  ;;  %v36_v4 = vmul.f32 2.0, %v24_v1  ;;  %v26_v6 = vld [vmem:[#allocation2 + $0x18] sm:$0xff]  ;;  %v27_v7 = vld [vmem:[#allocation2 + $0x20] sm:$0xff]  ;;  %s76_s20 = sshll.u32 %s155_s0, 4  ;;  %s77_s20 = int_to_ptr.vmem [resolvable:$true] %s76_s20 }
  0x15   :  { %v37_v5 = vmul.f32 2.0, %v25_v2  ;;  %v28_v8 = vld [vmem:[#allocation2 + $0x28] sm:$0xff]  ;;  %v38_v9 = vmul.f32 2.0, %v26_v6  ;;  %v39_v10 = vmul.f32 2.0, %v27_v7  ;;  %v29_v12 = vld [vmem:[#allocation2 + $0x30] sm:$0xff]  ;;  %v30_v13 = vld [vmem:[#allocation2 + $0x38] sm:$0xff]  ;;  %p131_p9 = scmp.lt.s32.totalorder %s77_s20, %s77_s20 }
  0x16   :  { %v40_v11 = vmul.f32 2.0, %v28_v8  ;;  %v31_v14 = vld [vmem:[#allocation2 + $0x40] sm:$0xff]  ;;  %v88_v15 = vadd.f32 -1.0, %v35_v3  ;;  %v89_v16 = vadd.f32 -1.0, %v36_v4  ;;  %v41_v18 = vmul.f32 2.0, %v29_v12  ;;  %v32_v19 = vld [vmem:[#allocation2 + $0x48] sm:$0xff] }
  0x17   :  { %v90_v17 = vadd.f32 -1.0, %v37_v5  ;;  %v33_v20 = vld [vmem:[#allocation2 + $0x50] sm:$0xff]  ;;  %v91_v21 = vadd.f32 -1.0, %v38_v9  ;;  %v92_v22 = vadd.f32 -1.0, %v39_v10  ;;  %v42_v24 = vmul.f32 2.0, %v30_v13  ;;  %v34_v25 = vld [vmem:[#allocation2 + $0x58] sm:$0xff] }
  0x18   :  { %v93_v23 = vadd.f32 -1.0, %v40_v11  ;;  %59 = vst [vmem:[#allocation5] sm:$0xff] %v88_v15  ;;  %60 = vst [vmem:[#allocation5 + $0x8] sm:$0xff] %v89_v16  ;;  %v94_v26 = vadd.f32 -1.0, %v41_v18  ;;  %v43_v27 = vmul.f32 2.0, %v31_v14  ;;  %v44_v28 = vmul.f32 2.0, %v32_v19 }
  0x19   :  { %61 = vst [vmem:[#allocation5 + $0x10] sm:$0xff] %v90_v17  ;;  %v45_v29 = vmul.f32 2.0, %v33_v20  ;;  %62 = vst [vmem:[#allocation5 + $0x18] sm:$0xff] %v91_v21  ;;  %v95_v30 = vadd.f32 -1.0, %v42_v24  ;;  %v46_v31 = vmul.f32 2.0, %v34_v25  ;;  %s126_s21 = scalar_lea.vmem %s77_s20, 1536 }
  0x1a   :  { %63 = vst [vmem:[#allocation5 + $0x20] sm:$0xff] %v92_v22  ;;  %64 = vst [vmem:[#allocation5 + $0x28] sm:$0xff] %v93_v23  ;;  %v96_v32 = vadd.f32 -1.0, %v43_v27  ;;  %v97_v33 = vadd.f32 -1.0, %v44_v28  ;;  %p127_p8 = scmp.ne.s32.totalorder %s77_s20, %s126_s21  ;;  %p132_p10 = scmp.lt.s32.totalorder %s126_s21, %s126_s21 }
  0x1b   :  { %65 = vst [vmem:[#allocation5 + $0x30] sm:$0xff] %v94_v26  ;;  %v98_v34 = vadd.f32 -1.0, %v45_v29  ;;  %66 = vst [vmem:[#allocation5 + $0x38] sm:$0xff] %v95_v30  ;;  %v99_v35 = vadd.f32 -1.0, %v46_v31 }
  0x1c   :  { %67 = vst [vmem:[#allocation5 + $0x40] sm:$0xff] %v96_v32  ;;  %68 = vst [vmem:[#allocation5 + $0x48] sm:$0xff] %v97_v33  ;;  %p133_p11 = por %p132_p10, %p131_p9 }
  0x1d   :  { %69 = vst [vmem:[#allocation5 + $0x50] sm:$0xff] %v98_v34  ;;  %70 = vst [vmem:[#allocation5 + $0x58] sm:$0xff] %v99_v35 }
  0x1e   :  { %p134_p12 = pnand %p133_p11, %p127_p8 }
  0x20   :  { %137 = shalt.err (!%p134_p12)
}
  0x21   :  { %s138_s24 = scalar_lea.hbm %s197_s1, 1536 }
  0x22   :  { %p139_p13 = scmp.ne.s32.totalorder %s197_s1, %s138_s24  ;;  %p142_p0 = scmp.lt.u32.totalorder %s138_s24, %s197_s1 }
  0x24   :  { %p144_p1 = pnand %p142_p0, %p139_p13 }
  0x26   :  { %147 = shalt.err (!%p144_p1)
}
  0x27   :  { %82 = dma.vmem_to_hbm [thread:$0]  %s77_s20, 1536, %s197_s1, [#allocation4], %s153_s16, %s153_s16, %s154_s17  }
  0x28   :  { %150 = dma.done.wait [#allocation4], 1536  }
  0x29   :  { %151 = vsyncadd [#allocation4], 4294965760 }
  0x2a   :  { %86 = vsyncpa [#allocation3], 1 }
  0x2b   :  { %87 = vsyncpa [#allocation4], 1 }

</bundles_post_ra>
